<compile_context>
chip_gen: v6e
topology: v6e:2x2x1
jax: 0.10.0
libtpu: 0.0.40
codegen_flags: <defaults>
</compile_context>

<pallas_src>
import jax
import jax.numpy as jnp
from jax.experimental import pallas as pl
from jax.experimental.pallas import tpu as pltpu


def _locked_dropout_kernel(x_ref, m_ref, o_ref):
    # x_ref / o_ref: (TT, BH_TILE) tile.  m_ref: (1, BH_TILE) pre-scaled mask;
    # broadcasts over the row (time) axis.  Native-dtype multiply, no f32
    # round-trip for bf16 inputs.
    o_ref[...] = x_ref[...] * m_ref[...]


def _round_up(n, m):
    return (n + m - 1) // m * m


def _pick_tiles(T, BHp, itemsize, *, target_bytes=8 << 20):
    """Pick (row_tile, lane_tile).

    lane_tile: multiple of 128 (or the full padded width) so even an 8-row
    tile fits the budget for very wide models.
    row_tile: multiple of 8 (or the full T), as large as the budget allows,
    but capped at ~ceil(T/2) so v7x megacore gets >= 2 parallel grid steps.
    """
    # Lane (last-dim) tile.
    if BHp * 8 * itemsize <= target_bytes:
        bh_tile = BHp
    else:
        bh_tile = max(128, (target_bytes // (8 * itemsize)) // 128 * 128)
        bh_tile = min(bh_tile, BHp)

    row_bytes = bh_tile * itemsize

    # Row (time) tile.
    if T <= 8:
        tt = T                                  # full dim (allowed even if < 8)
    else:
        tt = max(8, min(T, (target_bytes // max(row_bytes, 1)) // 8 * 8))
        if tt >= T and T >= 16:
            # Ensure >= 2 grid steps along T so both v7x TensorCores get work.
            tt = _round_up(pl.cdiv(T, 2), 8)
    return int(tt), int(bh_tile)


def locked_dropout(x, key, *, dropout=0.2, training=True):
    """LockedDropout forward. x: (T, B, H). key: jax PRNG key."""
    if not training or not dropout:
        return x

    keep_prob = 1.0 - float(dropout)
    if keep_prob <= 0.0:
        # dropout == 1.0: everything dropped (avoid 1/0 -> NaN mask).
        return jnp.zeros_like(x)

    T, B, H = x.shape
    BH = B * H
    BHp = _round_up(BH, 128)
    itemsize = jnp.dtype(x.dtype).itemsize

    # One (1, B*H) mask shared ("locked") across all time-steps, scaled in f32
    # then cast to x.dtype.
    mask = jax.random.bernoulli(key, keep_prob, (1, BH)).astype(jnp.float32)
    mask = (mask * (1.0 / keep_prob)).astype(x.dtype)

    x2 = x.reshape(T, BH)
    if BHp != BH:
        # Pad the lane axis to a multiple of 128 -> unmasked dense stores.
        x2 = jnp.pad(x2, ((0, 0), (0, BHp - BH)))
        mask = jnp.pad(mask, ((0, 0), (0, BHp - BH)))

    tt, bh_tile = _pick_tiles(T, BHp, itemsize)
    grid = (pl.cdiv(T, tt), pl.cdiv(BHp, bh_tile))

    # VMEM budget: x + out tiles, double-buffered, plus mask and slack.
    tile_bytes = tt * bh_tile * itemsize
    mask_bytes = bh_tile * itemsize
    vmem_needed = 4 * tile_bytes + 2 * mask_bytes + (1 << 20)
    vmem_limit = int(min(max(vmem_needed, 16 << 20), 48 << 20))

    out = pl.pallas_call(
        _locked_dropout_kernel,
        out_shape=jax.ShapeDtypeStruct((T, BHp), x.dtype),
        grid=grid,
        in_specs=[
            pl.BlockSpec((tt, bh_tile), lambda t, j: (t, j)),   # x tile
            pl.BlockSpec((1, bh_tile), lambda t, j: (0, j)),    # mask (time-invariant)
        ],
        out_specs=pl.BlockSpec((tt, bh_tile), lambda t, j: (t, j)),
        input_output_aliases={0: 0},            # run dropout in place on x2
        compiler_params=pltpu.CompilerParams(
            dimension_semantics=("parallel", "parallel"),  # fully independent tiles
            vmem_limit_bytes=vmem_limit,
        ),
    )(x2, mask)

    if BHp != BH:
        out = out[:, :BH]
    return out.reshape(T, B, H)


if __name__ == "__main__":
    key = jax.random.PRNGKey(0)
    kx, km, kx2, km2 = jax.random.split(key, 4)

    # --- Case 1: aligned width (B*H = 128), single grid step ------------------
    T, B, H = 8, 4, 32
    x = jax.random.normal(kx, (T, B, H), dtype=jnp.float32)
    out = jax.block_until_ready(locked_dropout(x, km, dropout=0.2, training=True))
    assert out.shape == x.shape and out.dtype == x.dtype

    # Mask is "locked" across time: out[t] * x[0] == out[0] * x[t] elementwise.
    assert jnp.allclose(out * x[0][None], out[0][None] * x, rtol=1e-5, atol=1e-5)
    # Each element is either dropped (0) or scaled by exactly 1/(1-p) = 1.25.
    ok = jnp.all((jnp.abs(out) < 1e-6) | (jnp.abs(out - 1.25 * x) < 1e-4))
    assert bool(ok)

    # --- Case 2: unaligned width (padding path) + megacore split (T >= 16) ----
    T2, B2, H2 = 16, 2, 33   # B*H = 66 -> padded to 128; T=16 -> 2 row tiles
    x2 = jax.random.normal(kx2, (T2, B2, H2), dtype=jnp.float32)
    out2 = jax.block_until_ready(locked_dropout(x2, km2, dropout=0.3, training=True))
    assert out2.shape == x2.shape and out2.dtype == x2.dtype
    assert jnp.allclose(out2 * x2[0][None], out2[0][None] * x2, rtol=1e-5, atol=1e-5)
    scale2 = 1.0 / 0.7
    ok2 = jnp.all((jnp.abs(out2) < 1e-6) | (jnp.abs(out2 - scale2 * x2) < 1e-3))
    assert bool(ok2)

    # --- Degenerate / passthrough cases ---------------------------------------
    assert jnp.array_equal(locked_dropout(x, km, dropout=0.2, training=False), x)
    assert jnp.array_equal(locked_dropout(x, km, dropout=0.0, training=True), x)
    assert jnp.array_equal(
        locked_dropout(x, km, dropout=1.0, training=True), jnp.zeros_like(x)
    )

    print("KERNEL_OK")
</pallas_src>

<mosaic_0001>
module attributes {stable_mosaic.version = 11 : i64} {
  func.func @_locked_dropout_kernel(%arg0: i32, %arg1: i32, %arg2: memref<8x128xf32, #tpu.memory_space<vmem>>, %arg3: memref<1x128xf32, #tpu.memory_space<vmem>>, %arg4: memref<8x128xf32, #tpu.memory_space<vmem>>) attributes {dimension_semantics = [#tpu.dimension_semantics<parallel>, #tpu.dimension_semantics<parallel>], iteration_bounds = array<i64: 1, 1>, scalar_prefetch = 0 : i64, scratch_operands = 0 : i64, tpu.core_type = #tpu.core_type<tc>, window_params = [{transform_indices = @transform_0, window_bounds = array<i64: 8, 128>}, {transform_indices = @transform_1, window_bounds = array<i64: 1, 128>}, {transform_indices = @transform_2, window_bounds = array<i64: 8, 128>}]} {
    %c0 = arith.constant 0 : index
    %c0_0 = arith.constant 0 : index
    %0 = vector.load %arg2[%c0, %c0_0] : memref<8x128xf32, #tpu.memory_space<vmem>>, vector<8x128xf32>
    %c0_1 = arith.constant 0 : index
    %c0_2 = arith.constant 0 : index
    %1 = vector.load %arg3[%c0_1, %c0_2] : memref<1x128xf32, #tpu.memory_space<vmem>>, vector<1x128xf32>
    %2 = vector.broadcast %1 : vector<1x128xf32> to vector<8x128xf32>
    %3 = arith.mulf %0, %2 : vector<8x128xf32>
    %c0_3 = arith.constant 0 : index
    %c0_4 = arith.constant 0 : index
    %4 = vector.load %arg4[%c0_3, %c0_4] : memref<8x128xf32, #tpu.memory_space<vmem>>, vector<8x128xf32>
    tpu.vector_store %arg4[%c0_3, %c0_4], %3 {strides = array<i32>} : memref<8x128xf32, #tpu.memory_space<vmem>>, vector<8x128xf32>,
    return
  }
  func.func @transform_0(%arg0: i32, %arg1: i32) -> (i32, i32) {
    %c0_i32 = arith.constant 0 : i32
    return %arg0, %arg1 : i32, i32
  }
  func.func @transform_1(%arg0: i32, %arg1: i32) -> (i32, i32) {
    %c0_i32 = arith.constant 0 : i32
    %c0_i32_0 = arith.constant 0 : i32
    return %c0_i32, %arg1 : i32, i32
  }
  func.func @transform_2(%arg0: i32, %arg1: i32) -> (i32, i32) {
    %c0_i32 = arith.constant 0 : i32
    return %arg0, %arg1 : i32, i32
  }
}

</mosaic_0001>

<bundles_post_ra>
// kernel: tpu_custom_call.1
= control target key start
LH: loop header
LB: loop body
LE: loop exit
PB: predicated region body
PF: predicated region fallthrough
CT: control target
= control target key end

     0   :  { %7 = vsyncpa [#allocation3], 0  ;;  %s122_s0 = inlined_call_operand.hbm [shape: f32[8,128], index: 0, kind: input, shape index: {}, may-alias: {0,2}]   ;;  %s123_s1 = inlined_call_operand.vmem [shape: f32[1,128], index: 1, kind: input, shape index: {}]   ;;  %s124_s2 = inlined_call_operand.hbm [shape: f32[8,128], index: 2, kind: output, shape index: {}, may-alias: {0,2}]  }
   0x1   :  { %8 = vsyncpa [#allocation4], 0  ;;  %s96_s9 = smov [#allocation2]  }
   0x2   :  { %s15_s10 = sshll.u32 %s96_s9, 4  ;;  %s16_s10 = int_to_ptr.vmem [resolvable:$true] %s15_s10 }
   0x3   :  { %s60_s11 = scalar_lea.vmem %s16_s10, 128  ;;  %p65_p1 = scmp.lt.s32.totalorder %s16_s10, %s16_s10 }
   0x4   :  { %p61_p0 = scmp.ne.s32.totalorder %s16_s10, %s60_s11  ;;  %p66_p2 = scmp.lt.s32.totalorder %s60_s11, %s60_s11 }
   0x6   :  { %p67_p3 = por %p66_p2, %p65_p1 }
   0x8   :  { %p68_p4 = pnand %p67_p3, %p61_p0 }
   0xa   :  { %71 = shalt.err (!%p68_p4)
}
   0xb   :  { %18 = dma.hbm_to_vmem [thread:$0]  %s122_s0, 128, %s16_s10, [#allocation3]  }
   0xc   :  { %92 = dma.done.wait [#allocation3], 128  }
   0xd   :  { %93 = vsyncadd [#allocation3], 4294967168  ;;  %s97_s14 = smov [#allocation5]   ;;  %v24_v0 = vld [vmem:[#allocation2] sm:$0xff] }
   0xe   :  { %s40_s15 = sshll.u32 %s97_s14, 4  ;;  %v49_v1 = vld [vmem:[%s123_s1] ss:$0 sm:$0xff]  ;;  %s41_s15 = int_to_ptr.vmem [resolvable:$true] %s40_s15 }
   0xf   :  { %v32_v2 = vmul.f32 %v49_v1, %v24_v0  ;;  %s72_s18 = scalar_lea.vmem %s41_s15, 128  ;;  %p77_p6 = scmp.lt.s32.totalorder %s41_s15, %s41_s15 }
  0x10   :  { %p73_p5 = scmp.ne.s32.totalorder %s41_s15, %s72_s18  ;;  %p78_p7 = scmp.lt.s32.totalorder %s72_s18, %s72_s18 }
  0x11   :  { %33 = vst [vmem:[#allocation5] sm:$0xff] %v32_v2 }
  0x12   :  { %p79_p8 = por %p78_p7, %p77_p6 }
  0x14   :  { %p80_p9 = pnand %p79_p8, %p73_p5 }
  0x16   :  { %83 = shalt.err (!%p80_p9)
}
  0x17   :  { %43 = dma.vmem_to_hbm [thread:$0]  %s41_s15, 128, %s124_s2, [#allocation4]  }
  0x18   :  { %94 = dma.done.wait [#allocation4], 128  }
  0x19   :  { %95 = vsyncadd [#allocation4], 4294967168 }
  0x1a   :  { %47 = vsyncpa [#allocation3], 1 }
  0x1b   :  { %48 = vsyncpa [#allocation4], 1 }

</bundles_post_ra>
